<compile_context>
chip_gen: v7x
topology: tpu7x:2x2x1
jax: 0.10.0
libtpu: 0.0.40
codegen_flags: <defaults>
</compile_context>

<pallas_src>
import jax
import jax.numpy as jnp
from jax.experimental import pallas as pl
from jax.experimental.pallas import tpu as pltpu

HIDDEN = 256
OUT = 10
DROP_P = 0.5          # F.dropout defaults: p=0.5, training=True
TILE_B = 512          # multiple of 256 -> full 256-wide M blocks on v6e/v7x MXU


def _fc_output_kernel(x_ref, scale_ref, w2_ref, b2_ref, w3_ref, b3_ref, o_ref):
    # fc2: [tB,256] @ [256,256] + [1,256]
    h = jnp.dot(x_ref[...], w2_ref[...],
                preferred_element_type=jnp.float32) + b2_ref[...]
    # relu
    h = jnp.maximum(h, 0.0)
    # dropout(p=0.5): scale_ref holds 0.0 (dropped) or 1/(1-p)=2.0 (kept)
    h = h * scale_ref[...].astype(jnp.float32)
    # fc3: [tB,256] @ [256,10] + [1,10]
    logits = jnp.dot(h, w3_ref[...],
                     preferred_element_type=jnp.float32) + b3_ref[...]
    # log_softmax over last dim (F.log_softmax on 2-D defaults to dim=1)
    m = jnp.max(logits, axis=-1, keepdims=True)
    z = logits - m
    lse = jnp.log(jnp.sum(jnp.exp(z), axis=-1, keepdims=True))
    o_ref[...] = z - lse


def _dropout_scale(key, batch):
    """Pre-scaled dropout mask: 0.0 with prob p, 1/(1-p) otherwise (bf16-exact)."""
    keep = jax.random.bernoulli(key, 1.0 - DROP_P, (batch, HIDDEN))
    return keep.astype(jnp.bfloat16) * jnp.asarray(1.0 / (1.0 - DROP_P),
                                                   dtype=jnp.bfloat16)


@jax.jit
def fc_output_model(x, w2, b2, w3, b3, key):
    """x: [B, 256] f32 -> [B, 10] f32 log-probabilities (training-mode dropout)."""
    B = x.shape[0]
    scale = _dropout_scale(key, B)

    tile_b = min(TILE_B, B)              # small batches: single full-array block
    grid = (pl.cdiv(B, tile_b),)

    tiled = lambda i: (i, 0)             # stream per batch tile
    resident = lambda i: (0, 0)          # weights/biases stay VMEM-resident

    flops = 2 * B * HIDDEN * (HIDDEN + OUT)
    bytes_accessed = (x.size * 4 + scale.size * 2 + w2.size * 4 + b2.size * 4
                      + w3.size * 4 + b3.size * 4 + B * OUT * 4)

    return pl.pallas_call(
        _fc_output_kernel,
        out_shape=jax.ShapeDtypeStruct((B, OUT), jnp.float32),
        grid=grid,
        in_specs=[
            pl.BlockSpec((tile_b, HIDDEN), tiled),      # x
            pl.BlockSpec((tile_b, HIDDEN), tiled),      # dropout scale mask
            pl.BlockSpec((HIDDEN, HIDDEN), resident),   # w2
            pl.BlockSpec((1, HIDDEN), resident),        # b2
            pl.BlockSpec((HIDDEN, OUT), resident),      # w3
            pl.BlockSpec((1, OUT), resident),           # b3
        ],
        out_specs=pl.BlockSpec((tile_b, OUT), tiled),
        compiler_params=pltpu.CompilerParams(
            dimension_semantics=("parallel",)),
        cost_estimate=pl.CostEstimate(
            flops=flops, transcendentals=B * OUT,
            bytes_accessed=bytes_accessed),
    )(x, scale, w2, b2, w3, b3)


def init_params(key):
    """Deterministic init matching nn.Linear default U(-1/sqrt(in), 1/sqrt(in)).

    Weights stored as [in_features, out_features] (transpose of PyTorch) so the
    kernel computes x @ W + b directly on the MXU.
    """
    k1, k2, k3, k4 = jax.random.split(key, 4)
    bound = 1.0 / jnp.sqrt(jnp.float32(HIDDEN))
    w2 = jax.random.uniform(k1, (HIDDEN, HIDDEN), jnp.float32, -bound, bound)
    b2 = jax.random.uniform(k2, (1, HIDDEN), jnp.float32, -bound, bound)
    w3 = jax.random.uniform(k3, (HIDDEN, OUT), jnp.float32, -bound, bound)
    b3 = jax.random.uniform(k4, (1, OUT), jnp.float32, -bound, bound)
    return w2, b2, w3, b3


if __name__ == "__main__":
    key = jax.random.PRNGKey(0)
    kx, kp, kd = jax.random.split(key, 3)

    B = 8  # small batch
    x = jax.random.normal(kx, (B, HIDDEN), jnp.float32)
    w2, b2, w3, b3 = init_params(kp)

    out = fc_output_model(x, w2, b2, w3, b3, kd)
    out = jax.block_until_ready(out)

    assert out.shape == (B, OUT)
    # log-softmax rows must (approximately) exponentiate-sum to 1
    assert jnp.allclose(jnp.sum(jnp.exp(out), axis=-1), 1.0, atol=1e-4)

    # pure-JAX reference with the identical dropout mask
    scale_ref = _dropout_scale(kd, B).astype(jnp.float32)
    h_ref = jnp.maximum(x @ w2 + b2, 0.0) * scale_ref
    ref = jax.nn.log_softmax(h_ref @ w3 + b3, axis=-1)
    assert jnp.allclose(out, ref, atol=1e-4, rtol=1e-4)

    print("KERNEL_OK")
</pallas_src>

<mosaic_0001>
module attributes {stable_mosaic.version = 11 : i64} {
  func.func @_fc_output_kernel(%arg0: i32, %arg1: memref<8x256xf32, #tpu.memory_space<vmem>>, %arg2: memref<8x256xbf16, #tpu.memory_space<vmem>>, %arg3: memref<256x256xf32, #tpu.memory_space<vmem>>, %arg4: memref<1x256xf32, #tpu.memory_space<vmem>>, %arg5: memref<256x10xf32, #tpu.memory_space<vmem>>, %arg6: memref<1x10xf32, #tpu.memory_space<vmem>>, %arg7: memref<8x10xf32, #tpu.memory_space<vmem>>) attributes {dimension_semantics = [#tpu.dimension_semantics<parallel>], iteration_bounds = array<i64: 1>, scalar_prefetch = 0 : i64, scratch_operands = 0 : i64, tpu.core_type = #tpu.core_type<tc>, window_params = [{transform_indices = @transform_0, window_bounds = array<i64: 8, 256>}, {transform_indices = @transform_1, window_bounds = array<i64: 8, 256>}, {pipeline_mode = #tpu.pipeline_mode<synchronous>, transform_indices = @transform_2, window_bounds = array<i64: 256, 256>}, {pipeline_mode = #tpu.pipeline_mode<synchronous>, transform_indices = @transform_3, window_bounds = array<i64: 1, 256>}, {pipeline_mode = #tpu.pipeline_mode<synchronous>, transform_indices = @transform_4, window_bounds = array<i64: 256, 10>}, {pipeline_mode = #tpu.pipeline_mode<synchronous>, transform_indices = @transform_5, window_bounds = array<i64: 1, 10>}, {transform_indices = @transform_6, window_bounds = array<i64: 8, 10>}]} {
    %c0 = arith.constant 0 : index
    %c0_0 = arith.constant 0 : index
    %0 = vector.load %arg1[%c0, %c0_0] : memref<8x256xf32, #tpu.memory_space<vmem>>, vector<8x256xf32>
    %c0_1 = arith.constant 0 : index
    %c0_2 = arith.constant 0 : index
    %1 = vector.load %arg3[%c0_1, %c0_2] : memref<256x256xf32, #tpu.memory_space<vmem>>, vector<256x256xf32>
    %cst = arith.constant dense<0.000000e+00> : vector<8x256xf32>
    %2 = tpu.matmul %0, %1, %cst {dimension_numbers = #tpu.dot_dimension_numbers<[1], [0], [0], [1], [0, 0, 1, 1], [], []>} : vector<8x256xf32>, vector<256x256xf32>, vector<8x256xf32> -> vector<8x256xf32>
    %c0_3 = arith.constant 0 : index
    %c0_4 = arith.constant 0 : index
    %3 = vector.load %arg4[%c0_3, %c0_4] : memref<1x256xf32, #tpu.memory_space<vmem>>, vector<1x256xf32>
    %4 = vector.broadcast %3 : vector<1x256xf32> to vector<8x256xf32>
    %5 = arith.addf %2, %4 : vector<8x256xf32>
    %cst_5 = arith.constant 0.000000e+00 : f32
    %6 = vector.broadcast %cst_5 : f32 to vector<8x256xf32>
    %7 = arith.maximumf %5, %6 : vector<8x256xf32>
    %c0_6 = arith.constant 0 : index
    %c0_7 = arith.constant 0 : index
    %8 = vector.load %arg2[%c0_6, %c0_7] : memref<8x256xbf16, #tpu.memory_space<vmem>>, vector<8x256xbf16>
    %9 = arith.extf %8 : vector<8x256xbf16> to vector<8x256xf32>
    %10 = arith.mulf %7, %9 : vector<8x256xf32>
    %c0_8 = arith.constant 0 : index
    %c0_9 = arith.constant 0 : index
    %11 = vector.load %arg5[%c0_8, %c0_9] : memref<256x10xf32, #tpu.memory_space<vmem>>, vector<256x10xf32>
    %cst_10 = arith.constant dense<0.000000e+00> : vector<8x10xf32>
    %12 = tpu.matmul %10, %11, %cst_10 {dimension_numbers = #tpu.dot_dimension_numbers<[1], [0], [0], [1], [0, 0, 1, 1], [], []>} : vector<8x256xf32>, vector<256x10xf32>, vector<8x10xf32> -> vector<8x10xf32>
    %c0_11 = arith.constant 0 : index
    %c0_12 = arith.constant 0 : index
    %13 = vector.load %arg6[%c0_11, %c0_12] : memref<1x10xf32, #tpu.memory_space<vmem>>, vector<1x10xf32>
    %14 = vector.broadcast %13 : vector<1x10xf32> to vector<8x10xf32>
    %15 = arith.addf %12, %14 : vector<8x10xf32>
    %cst_13 = arith.constant dense<0xFF800000> : vector<8xf32>
    %16 = vector.multi_reduction <maximumf>, %15, %cst_13 [1] : vector<8x10xf32> to vector<8xf32>
    %17 = vector.shape_cast %16 : vector<8xf32> to vector<8x1xf32>
    %18 = vector.broadcast %17 : vector<8x1xf32> to vector<8x10xf32>
    %19 = arith.subf %15, %18 : vector<8x10xf32>
    %20 = math.exp %19 : vector<8x10xf32>
    %cst_14 = arith.constant dense<0.000000e+00> : vector<8xf32>
    %21 = vector.multi_reduction <add>, %20, %cst_14 [1] : vector<8x10xf32> to vector<8xf32>
    %22 = vector.shape_cast %21 : vector<8xf32> to vector<8x1xf32>
    %23 = math.log %22 : vector<8x1xf32>
    %24 = vector.broadcast %23 : vector<8x1xf32> to vector<8x10xf32>
    %25 = arith.subf %19, %24 : vector<8x10xf32>
    %c0_15 = arith.constant 0 : index
    %c0_16 = arith.constant 0 : index
    %26 = vector.load %arg7[%c0_15, %c0_16] : memref<8x10xf32, #tpu.memory_space<vmem>>, vector<8x10xf32>
    tpu.vector_store %arg7[%c0_15, %c0_16], %25 {strides = array<i32>} : memref<8x10xf32, #tpu.memory_space<vmem>>, vector<8x10xf32>,
    return
  }
  func.func @transform_0(%arg0: i32) -> (i32, i32) {
    %c0_i32 = arith.constant 0 : i32
    %c0_i32_0 = arith.constant 0 : i32
    return %arg0, %c0_i32 : i32, i32
  }
  func.func @transform_1(%arg0: i32) -> (i32, i32) {
    %c0_i32 = arith.constant 0 : i32
    %c0_i32_0 = arith.constant 0 : i32
    return %arg0, %c0_i32 : i32, i32
  }
  func.func @transform_2(%arg0: i32) -> (i32, i32) {
    %c0_i32 = arith.constant 0 : i32
    %c0_i32_0 = arith.constant 0 : i32
    %c0_i32_1 = arith.constant 0 : i32
    return %c0_i32, %c0_i32_0 : i32, i32
  }
  func.func @transform_3(%arg0: i32) -> (i32, i32) {
    %c0_i32 = arith.constant 0 : i32
    %c0_i32_0 = arith.constant 0 : i32
    %c0_i32_1 = arith.constant 0 : i32
    return %c0_i32, %c0_i32_0 : i32, i32
  }
  func.func @transform_4(%arg0: i32) -> (i32, i32) {
    %c0_i32 = arith.constant 0 : i32
    %c0_i32_0 = arith.constant 0 : i32
    %c0_i32_1 = arith.constant 0 : i32
    return %c0_i32, %c0_i32_0 : i32, i32
  }
  func.func @transform_5(%arg0: i32) -> (i32, i32) {
    %c0_i32 = arith.constant 0 : i32
    %c0_i32_0 = arith.constant 0 : i32
    %c0_i32_1 = arith.constant 0 : i32
    return %c0_i32, %c0_i32_0 : i32, i32
  }
  func.func @transform_6(%arg0: i32) -> (i32, i32) {
    %c0_i32 = arith.constant 0 : i32
    %c0_i32_0 = arith.constant 0 : i32
    return %arg0, %c0_i32 : i32, i32
  }
}

</mosaic_0001>

<bundles_post_ra>
// kernel: fc_output_model.1
= control target key start
LH: loop header
LB: loop body
LE: loop exit
PB: predicated region body
PF: predicated region fallthrough
CT: control target
= control target key end

     0   :  { %11 = vsyncpa [#allocation3], 0  ;;  %s697_s0 = inlined_call_operand.vmem [shape: f32[8,256], index: 0, kind: input, shape index: {}]   ;;  %s698_s1 = inlined_call_operand.vmem [shape: bf16[8,256], index: 1, kind: input, shape index: {}]   ;;  %s699_s2 = inlined_call_operand.hbm [shape: f32[256,256], index: 2, kind: input, shape index: {}]   ;;  %s700_s3 = inlined_call_operand.vmem [shape: f32[1,256], index: 3, kind: input, shape index: {}]   ;;  %s701_s4 = inlined_call_operand.vmem [shape: f32[256,10], index: 4, kind: input, shape index: {}]   ;;  %s702_s5 = inlined_call_operand.vmem [shape: f32[1,10], index: 5, kind: input, shape index: {}]   ;;  %s703_s6 = inlined_call_operand.hbm [shape: f32[8,10], index: 6, kind: output, shape index: {}]  }
   0x1   :  { %12 = vsyncpa [#allocation4], 0  ;;  %s520_s21 = smov [#allocation2]   ;;  %s472_s25 = scalar_lea.hbm %s699_s2, 8192 }
   0x2   :  { %s22_s22 = sshll.u32 %s520_s21, 4  ;;  %p473_p0 = scmp.ne.s32.totalorder %s699_s2, %s472_s25  ;;  %s23_s22 = int_to_ptr.vmem [resolvable:$true] %s22_s22 }
   0x3   :  { %p476_p1 = scmp.lt.u32.totalorder %s472_s25, %s699_s2 }
   0x5   :  { %p478_p2 = pnand %p476_p1, %p473_p0 }
   0x7   :  { %481 = shalt.err (!%p478_p2)
}
   0x8   :  { %s482_s30 = scalar_lea.vmem %s23_s22, 8192  ;;  %p487_p4 = scmp.lt.s32.totalorder %s23_s22, %s23_s22 }
   0x9   :  { %p483_p3 = scmp.ne.s32.totalorder %s23_s22, %s482_s30  ;;  %p488_p5 = scmp.lt.s32.totalorder %s482_s30, %s482_s30 }
   0xb   :  { %p489_p6 = por %p488_p5, %p487_p4 }
   0xd   :  { %p490_p7 = pnand %p489_p6, %p483_p3 }
   0xf   :  { %493 = shalt.err (!%p490_p7)
}
  0x10   :  { %s521_s7 = smov 256   ;;  %s522_s8 = smov 16  }
  0x11   :  { %28 = dma.hbm_to_vmem [thread:$0]  %s699_s2, 8192, %s23_s22, [#allocation3], %s521_s7, %s521_s7, %s522_s8  }
  0x12   :  { %516 = dma.done.wait [#allocation3], 8192  }
  0x13   :  { %517 = vsyncadd [#allocation3], 4294959104  ;;  %v41_v0 = vld [vmem:[#allocation2 + $0x8] sm:$0xff]  ;;  %v43_v1 = vld [vmem:[#allocation2 + $0x18] sm:$0xff]  ;;  %vm303_vm0 = vcmask 80896  }
  0x14   :  { %v40_v2 = vld [vmem:[#allocation2] sm:$0xff]  ;;  %v368_v3 = vpack.c.bf16 %v43_v1, %v41_v0  ;;  %v42_v4 = vld [vmem:[#allocation2 + $0x10] sm:$0xff]  ;;  %v45_v5 = vld [vmem:[#allocation2 + $0x28] sm:$0xff] }
  0x15   :  { %v47_v6 = vld [vmem:[#allocation2 + $0x38] sm:$0xff]  ;;  %v370_v7 = vpack.c.bf16 %v42_v4, %v40_v2  ;;  %v44_v9 = vld [vmem:[#allocation2 + $0x20] sm:$0xff]  ;;  %v46_v10 = vld [vmem:[#allocation2 + $0x30] sm:$0xff] }
  0x16   :  { %v372_v8 = vpack.c.bf16 %v47_v6, %v45_v5  ;;  %v49_v11 = vld [vmem:[#allocation2 + $0x48] sm:$0xff]  ;;  %369 = vmatprep.subr.bf16.mxu0 %v368_v3  ;;  %v51_v12 = vld [vmem:[#allocation2 + $0x58] sm:$0xff]  ;;  %v374_v13 = vpack.c.bf16 %v46_v10, %v44_v9  ;;  %v48_v15 = vld [vmem:[#allocation2 + $0x40] sm:$0xff] }
  0x17   :  { %371 = vmatpush1.bf16.msra.mxu0 %v370_v7  ;;  %v376_v14 = vpack.c.bf16 %v51_v12, %v49_v11  ;;  %v50_v16 = vld [vmem:[#allocation2 + $0x50] sm:$0xff]  ;;  %v53_v17 = vld [vmem:[#allocation2 + $0x68] sm:$0xff]  ;;  %v55_v18 = vld [vmem:[#allocation2 + $0x78] sm:$0xff] }
  0x18   :  { %373 = vmatprep.subr.bf16.mxu0 %v372_v8  ;;  %v378_v19 = vpack.c.bf16 %v50_v16, %v48_v15  ;;  %v380_v20 = vpack.c.bf16 %v55_v18, %v53_v17  ;;  %v52_v21 = vld [vmem:[#allocation2 + $0x60] sm:$0xff]  ;;  %v54_v22 = vld [vmem:[#allocation2 + $0x70] sm:$0xff]  ;;  %v57_v23 = vld [vmem:[#allocation2 + $0x88] sm:$0xff] }
  0x19   :  { %v59_v24 = vld [vmem:[#allocation2 + $0x98] sm:$0xff]  ;;  %v382_v25 = vpack.c.bf16 %v54_v22, %v52_v21  ;;  %v56_v27 = vld [vmem:[#allocation2 + $0x80] sm:$0xff]  ;;  %v58_v28 = vld [vmem:[#allocation2 + $0x90] sm:$0xff] }
  0x1a   :  { %v384_v26 = vpack.c.bf16 %v59_v24, %v57_v23  ;;  %v61_v29 = vld [vmem:[#allocation2 + $0xa8] sm:$0xff]  ;;  %v63_v30 = vld [vmem:[#allocation2 + $0xb8] sm:$0xff]  ;;  %v386_v31 = vpack.c.bf16 %v58_v28, %v56_v27  ;;  %v60_v33 = vld [vmem:[#allocation2 + $0xa0] sm:$0xff] }
  0x1b   :  { %375 = vmatpush1.bf16.msra.mxu0 %v374_v13  ;;  %v388_v32 = vpack.c.bf16 %v63_v30, %v61_v29  ;;  %v62_v34 = vld [vmem:[#allocation2 + $0xb0] sm:$0xff]  ;;  %v65_v35 = vld [vmem:[#allocation2 + $0xc8] sm:$0xff]  ;;  %v67_v36 = vld [vmem:[#allocation2 + $0xd8] sm:$0xff] }
  0x1c   :  { %377 = vmatprep.subr.bf16.mxu0 %v376_v14  ;;  %v390_v37 = vpack.c.bf16 %v62_v34, %v60_v33  ;;  %v64_v38 = vld [vmem:[#allocation2 + $0xc0] sm:$0xff]  ;;  %v66_v39 = vld [vmem:[#allocation2 + $0xd0] sm:$0xff]  ;;  %v392_v40 = vpack.c.bf16 %v67_v36, %v65_v35  ;;  %v69_v41 = vld [vmem:[#allocation2 + $0xe8] sm:$0xff] }
  0x1d   :  { %v71_v42 = vld [vmem:[#allocation2 + $0xf8] sm:$0xff]  ;;  %v39_v43 = vld [vmem:[%s697_s0 + $0x8] sm:$0xff]  ;;  %v210_v44 = vld [vmem:[%s701_s4 + $0x80] sm:$0xff]  ;;  %v394_v51 = vpack.c.bf16 %v66_v39, %v64_v38 }
  0x1e   :  { %180 = vmatprep.mubr.f32.mxu0 %v39_v43  ;;  %v211_v45 = vld [vmem:[%s701_s4 + $0x88] sm:$0xff]  ;;  %v194_v46 = vld [vmem:[%s701_s4] sm:$0xff]  ;;  %v212_v49 = vld [vmem:[%s701_s4 + $0x90] sm:$0xff]  ;;  %v396_v57 = vpack.c.bf16 %v71_v42, %v69_v41 }
  0x1f   :  { %379 = vmatpush1.bf16.msra.mxu0 %v378_v19  ;;  %v432_v47 = vpack.c.bf16 %v211_v45, %v210_v44  ;;  %v195_v48 = vld [vmem:[%s701_s4 + $0x8] sm:$0xff]  ;;  %v213_v50 = vld [vmem:[%s701_s4 + $0x98] sm:$0xff]  ;;  %v196_v54 = vld [vmem:[%s701_s4 + $0x10] sm:$0xff] }
  0x20   :  { %381 = vmatprep.subr.bf16.mxu0 %v380_v20  ;;  %v434_v52 = vpack.c.bf16 %v195_v48, %v194_v46  ;;  %v436_v53 = vpack.c.bf16 %v213_v50, %v212_v49  ;;  %v197_v55 = vld [vmem:[%s701_s4 + $0x18] sm:$0xff]  ;;  %v214_v56 = vld [vmem:[%s701_s4 + $0xa0] sm:$0xff]  ;;  %v70_v59 = vld [vmem:[#allocation2 + $0xf0] sm:$0xff] }
  0x21   :  { %v68_v58 = vld [vmem:[#allocation2 + $0xe0] sm:$0xff]  ;;  %433 = vmatprep.subr.bf16.mxu1 %v432_v47  ;;  %v215_v60 = vld [vmem:[%s701_s4 + $0xa8] sm:$0xff]  ;;  %v75_v62 = vld [vmem:[#allocation2 + $0x118] sm:$0xff]  ;;  %v438_v63 = vpack.c.bf16 %v197_v55, %v196_v54 }
  0x22   :  { %v73_v61 = vld [vmem:[#allocation2 + $0x108] sm:$0xff]  ;;  %435 = vmatpush3.bf16.msra.mxu1 %v434_v52  ;;  %v440_v0 = vpack.c.bf16 %v215_v60, %v214_v56  ;;  %v198_v1 = vld [vmem:[%s701_s4 + $0x20] sm:$0xff]  ;;  %v398_v3 = vpack.c.bf16 %v70_v59, %v68_v58  ;;  %v216_v4 = vld [vmem:[%s701_s4 + $0xb0] sm:$0xff] }
  0x23   :  { %383 = vmatpush1.bf16.msra.mxu0 %v382_v25  ;;  %437 = vmatprep.subr.bf16.mxu1 %v436_v53  ;;  %v199_v2 = vld [vmem:[%s701_s4 + $0x28] sm:$0xff]  ;;  %v217_v5 = vld [vmem:[%s701_s4 + $0xb8] sm:$0xff]  ;;  %v400_v6 = vpack.c.bf16 %v75_v62, %v73_v61  ;;  %v72_v7 = vld [vmem:[#allocation2 + $0x100] sm:$0xff] }
  0x24   :  { %385 = vmatprep.subr.bf16.mxu0 %v384_v26  ;;  %v74_v8 = vld [vmem:[#allocation2 + $0x110] sm:$0xff]  ;;  %v77_v9 = vld [vmem:[#allocation2 + $0x128] sm:$0xff]  ;;  %v79_v10 = vld [vmem:[#allocation2 + $0x138] sm:$0xff]  ;;  %v442_v11 = vpack.c.bf16 %v199_v2, %v198_v1  ;;  %v444_v12 = vpack.c.bf16 %v217_v5, %v216_v4 }
  0x25   :  { %v200_v13 = vld [vmem:[%s701_s4 + $0x30] sm:$0xff]  ;;  %v201_v14 = vld [vmem:[%s701_s4 + $0x38] sm:$0xff]  ;;  %v402_v15 = vpack.c.bf16 %v74_v8, %v72_v7  ;;  %v218_v16 = vld [vmem:[%s701_s4 + $0xc0] sm:$0xff]  ;;  %v404_v18 = vpack.c.bf16 %v79_v10, %v77_v9 }
  0x26   :  { %439 = vmatpush3.bf16.msra.mxu1 %v438_v63  ;;  %v219_v17 = vld [vmem:[%s701_s4 + $0xc8] sm:$0xff]  ;;  %v76_v19 = vld [vmem:[#allocation2 + $0x120] sm:$0xff]  ;;  %v78_v20 = vld [vmem:[#allocation2 + $0x130] sm:$0xff]  ;;  %v446_v23 = vpack.c.bf16 %v201_v14, %v200_v13 }
  0x27   :  { %387 = vmatpush1.bf16.msra.mxu0 %v386_v31  ;;  %441 = vmatprep.subr.bf16.mxu1 %v440_v0  ;;  %v81_v21 = vld [vmem:[#allocation2 + $0x148] sm:$0xff]  ;;  %v83_v22 = vld [vmem:[#allocation2 + $0x158] sm:$0xff]  ;;  %v448_v24 = vpack.c.bf16 %v219_v17, %v218_v16  ;;  %v202_v25 = vld [vmem:[%s701_s4 + $0x40] sm:$0xff]  ;;  %v406_v27 = vpack.c.bf16 %v78_v20, %v76_v19 }
  0x28   :  { %389 = vmatprep.subr.bf16.mxu0 %v388_v32  ;;  %v203_v26 = vld [vmem:[%s701_s4 + $0x48] sm:$0xff]  ;;  %v220_v28 = vld [vmem:[%s701_s4 + $0xd0] sm:$0xff]  ;;  %v221_v29 = vld [vmem:[%s701_s4 + $0xd8] sm:$0xff]  ;;  %v408_v30 = vpack.c.bf16 %v83_v22, %v81_v21 }
  0x29   :  { %v80_v31 = vld [vmem:[#allocation2 + $0x140] sm:$0xff]  ;;  %v82_v32 = vld [vmem:[#allocation2 + $0x150] sm:$0xff]  ;;  %v85_v33 = vld [vmem:[#allocation2 + $0x168] sm:$0xff]  ;;  %v450_v35 = vpack.c.bf16 %v203_v26, %v202_v25  ;;  %v452_v36 = vpack.c.bf16 %v221_v29, %v220_v28 }
  0x2a   :  { %443 = vmatpush3.bf16.msra.mxu1 %v442_v11  ;;  %v87_v34 = vld [vmem:[#allocation2 + $0x178] sm:$0xff]  ;;  %v410_v39 = vpack.c.bf16 %v82_v32, %v80_v31  ;;  %v84_v41 = vld [vmem:[#allocation2 + $0x160] sm:$0xff]  ;;  %v86_v42 = vld [vmem:[#allocation2 + $0x170] sm:$0xff] }
  0x2b   :  { %391 = vmatpush1.bf16.msra.mxu0 %v390_v37  ;;  %445 = vmatprep.subr.bf16.mxu1 %v444_v12  ;;  %v204_v37 = vld [vmem:[%s701_s4 + $0x50] sm:$0xff]  ;;  %v205_v38 = vld [vmem:[%s701_s4 + $0x58] sm:$0xff]  ;;  %v89_v43 = vld [vmem:[#allocation2 + $0x188] sm:$0xff]  ;;  %v414_v46 = vpack.c.bf16 %v86_v42, %v84_v41 }
  0x2c   :  { %393 = vmatprep.subr.bf16.mxu0 %v392_v40  ;;  %v412_v40 = vpack.c.bf16 %v87_v34, %v85_v33  ;;  %v91_v44 = vld [vmem:[#allocation2 + $0x198] sm:$0xff]  ;;  %v454_v45 = vpack.c.bf16 %v205_v38, %v204_v37  ;;  %v88_v48 = vld [vmem:[#allocation2 + $0x180] sm:$0xff]  ;;  %v90_v49 = vld [vmem:[#allocation2 + $0x190] sm:$0xff] }
  0x2d   :  { %v416_v47 = vpack.c.bf16 %v91_v44, %v89_v43  ;;  %v93_v50 = vld [vmem:[#allocation2 + $0x1a8] sm:$0xff]  ;;  %v418_v52 = vpack.c.bf16 %v90_v49, %v88_v48  ;;  %v92_v54 = vld [vmem:[#allocation2 + $0x1a0] sm:$0xff]  ;;  %v94_v55 = vld [vmem:[#allocation2 + $0x1b0] sm:$0xff] }
  0x2e   :  { %447 = vmatpush3.bf16.msra.mxu1 %v446_v23  ;;  %v97_v56 = vld [vmem:[#allocation2 + $0x1c8] sm:$0xff]  ;;  %v422_v58 = vpack.c.bf16 %v94_v55, %v92_v54  ;;  %v96_v60 = vld [vmem:[#allocation2 + $0x1c0] sm:$0xff]  ;;  %v98_v61 = vld [vmem:[#allocation2 + $0x1d0] sm:$0xff] }
  0x2f   :  { %395 = vmatpush1.bf16.msra.mxu0 %v394_v51  ;;  %449 = vmatprep.subr.bf16.mxu1 %v448_v24  ;;  %v95_v51 = vld [vmem:[#allocation2 + $0x1b8] sm:$0xff]  ;;  %v101_v62 = vld [vmem:[#allocation2 + $0x1e8] sm:$0xff]  ;;  %v426_v0 = vpack.c.bf16 %v98_v61, %v96_v60  ;;  %v100_v2 = vld [vmem:[#allocation2 + $0x1e0] sm:$0xff] }
  0x30   :  { %397 = vmatprep.subr.bf16.mxu0 %v396_v57  ;;  %v420_v53 = vpack.c.bf16 %v95_v51, %v93_v50  ;;  %v99_v57 = vld [vmem:[#allocation2 + $0x1d8] sm:$0xff]  ;;  %v38_v5 = vld [vmem:[%s697_s0] sm:$0xff]  ;;  %v223_v7 = vld [vmem:[%s701_s4 + $0xe8] sm:$0xff] }
  0x31   :  { %v424_v59 = vpack.c.bf16 %v99_v57, %v97_v56  ;;  %v103_v63 = vld [vmem:[#allocation2 + $0x1f8] sm:$0xff]  ;;  %v206_v9 = vld [vmem:[%s701_s4 + $0x60] sm:$0xff]  ;;  %v207_v10 = vld [vmem:[%s701_s4 + $0x68] sm:$0xff] }
  0x32   :  { %451 = vmatpush3.bf16.msra.mxu1 %v450_v35  ;;  %v428_v1 = vpack.c.bf16 %v103_v63, %v101_v62  ;;  %v458_v11 = vpack.c.bf16 %v207_v10, %v206_v9  ;;  %v224_v12 = vld [vmem:[%s701_s4 + $0xf0] sm:$0xff]  ;;  %v225_v13 = vld [vmem:[%s701_s4 + $0xf8] sm:$0xff]  ;;  %v104_v21 = vld [vmem:[%s700_s3] sm:$0x3] }
  0x33   :  { %399 = vmatpush1.bf16.msra.mxu0 %v398_v3  ;;  %453 = vmatprep.subr.bf16.mxu1 %v452_v36  ;;  %v102_v3 = vld [vmem:[#allocation2 + $0x1f0] sm:$0xff]  ;;  %v460_v14 = vpack.c.bf16 %v225_v13, %v224_v12  ;;  %v209_v16 = vld [vmem:[%s701_s4 + $0x78] sm:$0xff]  ;;  %v189_v25 = vld [vmem:[%s698_s1] sm:$0xff]  ;;  %s523_s1 = smov [#allocation5]  }
  0x34   :  { %401 = vmatprep.subr.bf16.mxu0 %v400_v6  ;;  %v430_v4 = vpack.c.bf16 %v102_v3, %v100_v2  ;;  %v222_v6 = vld [vmem:[%s701_s4 + $0xe0] sm:$0xff]  ;;  %v190_v32 = vunpack.c.l.bf16 %v189_v25  ;;  %s323_s7 = sshll.u32 %s523_s1, 4  ;;  %s324_s7 = int_to_ptr.vmem [resolvable:$true] %s323_s7 }
  0x35   :  { %v456_v8 = vpack.c.bf16 %v223_v7, %v222_v6  ;;  %v332_v38 = vld [vmem:[%s702_s5] ss:$0 sm:$0xff]  ;;  %s494_s5 = scalar_lea.vmem %s324_s7, 128  ;;  %p499_p9 = scmp.lt.s32.totalorder %s324_s7, %s324_s7 }
  0x36   :  { %455 = vmatpush3.bf16.msra.mxu1 %v454_v45  ;;  %p495_p8 = scmp.ne.s32.totalorder %s324_s7, %s494_s5  ;;  %p500_p10 = scmp.lt.s32.totalorder %s494_s5, %s494_s5 }
  0x37   :  { %403 = vmatpush1.bf16.msra.mxu0 %v402_v15  ;;  %457 = vmatprep.subr.bf16.mxu1 %v456_v8  ;;  %v208_v15 = vld [vmem:[%s701_s4 + $0x70] sm:$0xff] }
  0x38   :  { %405 = vmatprep.subr.bf16.mxu0 %v404_v18  ;;  %v462_v17 = vpack.c.bf16 %v209_v16, %v208_v15  ;;  %v106_v18 = vlaneseq  ;;  %p501_p11 = por %p500_p10, %p499_p9 }
  0x3a   :  { %459 = vmatpush3.bf16.msra.mxu1 %v458_v11  ;;  %v107_v19 = vshrl.u32 %v106_v18, 7  ;;  %p502_p12 = pnand %p501_p11, %p495_p8 }
  0x3b   :  { %407 = vmatpush1.bf16.msra.mxu0 %v406_v27  ;;  %461 = vmatprep.subr.bf16.mxu1 %v460_v14 }
  0x3c   :  { %409 = vmatprep.subr.bf16.mxu0 %v408_v30  ;;  %v108_v20 = vsub.s32 0, %v107_v19  ;;  %v112_v22 = vsub.s32 1, %v107_v19  ;;  %v191_v30 = vunpack.c.h.bf16 %v189_v25 }
  0x3e   :  { %463 = vmatpush3.bf16.msra.mxu1 %v462_v17  ;;  %v109_v23 = vrot.slane %v104_v21, %v108_v20  ;;  %v113_v24 = vrot.slane %v104_v21, %v112_v22 }
  0x3f   :  { %411 = vmatpush1.bf16.msra.mxu0 %v410_v39 }
  0x40   :  { %413 = vmatprep.subr.bf16.mxu0 %v412_v40 }
  0x43   :  { %415 = vmatpush1.bf16.msra.mxu0 %v414_v46 }
  0x44   :  { %417 = vmatprep.subr.bf16.mxu0 %v416_v47 }
  0x47   :  { %419 = vmatpush1.bf16.msra.mxu0 %v418_v52 }
  0x48   :  { %421 = vmatprep.subr.bf16.mxu0 %v420_v53 }
  0x4b   :  { %423 = vmatpush1.bf16.msra.mxu0 %v422_v58 }
  0x4c   :  { %425 = vmatprep.subr.bf16.mxu0 %v424_v59 }
  0x4f   :  { %427 = vmatpush1.bf16.msra.mxu0 %v426_v0 }
  0x50   :  { %429 = vmatprep.subr.bf16.mxu0 %v428_v1 }
  0x53   :  { %431 = vmatpush1.bf16.msra.mxu0 %v430_v4 }
  0x56   :  { %181 = vmatmul.mubr.f32.vlgmr.msra.gmra.mrb[0].mxu0 %v38_v5 }
 0x129   :  { %v182_v26 = vpop.f32.mrb[0].mxu0 }
 0x12a   :  { %v183_v27 = vadd.f32 %v182_v26, %v109_v23  ;;  %v184_v28 = vpop.f32.mrb[1].mxu0 }
 0x12b   :  { %v185_v29 = vadd.f32 %v184_v28, %v113_v24 }
 0x12c   :  { %v187_v31 = vmax.f32 %v183_v27, 0.0 }
 0x12d   :  { %v188_v33 = vmax.f32 %v185_v29, 0.0 }
 0x12e   :  { %v192_v35 = vmul.f32 %v190_v32, %v187_v31 }
 0x12f   :  { %v193_v34 = vmul.f32 %v191_v30, %v188_v33 }
 0x131   :  { %297 = vmatprep.mubr.f32.mxu1 %v193_v34 }
 0x132   :  { %298 = vmatmul.mubr.f32.vlgmr.msra.gmra.mrb[0].mxu1 %v192_v35 }
 0x205   :  { %v365_v36 = vpop.f32.mrb[0].mxu1 }
 0x206   :  { %v366_v37 = vpop.f32.mrb[1].mxu1 }
 0x207   :  { %v367_v39 = vadd.f32 %v366_v37, %v365_v36 }
 0x209   :  { %v300_v40 = vadd.f32 %v367_v39, %v332_v38 }
 0x20b   :  { %v304_v41 = vsel %vm303_vm0, %v300_v40, -inf }
 0x20c   :  { %305 = vmax.xlane.f32.xlu0 %v304_v41 }
 0x299   :  { %v306_v42 = vpop.xlane.xlu0 %305 }
 0x29a   :  { %v307_v43 = vsub.f32 %v300_v40, %v306_v42 }
 0x29c   :  { %v308_v44 = vmul.f32 1.442695, %v307_v43 }
 0x29e   :  { %468 = vpow2.f32 %v308_v44 }
 0x2a8   :  { %v469_v45 = vpop.eup %468 }
 0x2a9   :  { %v310_v46 = vsel %vm303_vm0, %v469_v45, 0.0 }
 0x2aa   :  { %311 = vadd.xlane.f32.xlu0 %v310_v46 }
 0x337   :  { %v312_v47 = vpop.xlane.xlu0 %311 }
 0x338   :  { %470 = vlog2.f32 %v312_v47 }
 0x342   :  { %v471_v48 = vpop.eup %470 }
 0x343   :  { %v314_v49 = vmul.f32 0.6931472, %v471_v48 }
 0x345   :  { %v315_v50 = vsub.f32 %v307_v43, %v314_v49 }
 0x347   :  { %316 = vst.msk [vmem:[#allocation5] sm:$0xff] %vm303_vm0, %v315_v50 }
 0x348   :  { %505 = shalt.err (!%p502_p12)
}
 0x349   :  { %s506_s10 = scalar_lea.hbm %s703_s6, 128 }
 0x34a   :  { %p507_p13 = scmp.ne.s32.totalorder %s703_s6, %s506_s10  ;;  %p510_p0 = scmp.lt.u32.totalorder %s506_s10, %s703_s6 }
 0x34c   :  { %p512_p1 = pnand %p510_p0, %p507_p13 }
 0x34e   :  { %515 = shalt.err (!%p512_p1)
}
 0x34f   :  { %326 = dma.vmem_to_hbm [thread:$0]  %s324_s7, 128, %s703_s6, [#allocation4]  }
 0x350   :  { %518 = dma.done.wait [#allocation4], 128  }
 0x351   :  { %519 = vsyncadd [#allocation4], 4294967168 }
 0x352   :  { %330 = vsyncpa [#allocation3], 1 }
 0x353   :  { %331 = vsyncpa [#allocation4], 1 }

</bundles_post_ra>
